<compile_context>
chip_gen: v5e
topology: v5e:2x2
jax: 0.10.0
libtpu: 0.0.40
codegen_flags: <defaults>
</compile_context>

<pallas_src>
import math
import functools

import jax
import jax.numpy as jnp
from jax import lax
from jax.experimental import pallas as pl
from jax.experimental.pallas import tpu as pltpu


# dot_general dimension_numbers contracting the LAST dim of both operands:
#   (m, d) x (n, d) -> (m, n)     (i.e. A @ B.T without materializing B.T)
_CONTRACT_LAST = (((1,), (1,)), ((), ()))


def _mha_kernel(q_ref, k_ref, v_ref, wq_ref, wk_ref, wv_ref, wot_ref,
                out_ref, attn_ref, acc_ref, *, scale, compute_dtype):
    # q_ref: (1, tq, D); k_ref/v_ref: (1, Sk, D)
    # wq_ref/wk_ref/wv_ref: (d_k, D) rows h*d_k:(h+1)*d_k of W_q/W_k/W_v
    # wot_ref: (d_k, D) rows h*d_k:(h+1)*d_k of W_o.T
    # out_ref: (1, tq, D); attn_ref: (1, 1, tq, Sk); acc_ref: (tq, D) f32 scratch
    h = pl.program_id(2)

    @pl.when(h == 0)
    def _():
        acc_ref[...] = jnp.zeros_like(acc_ref)

    q = q_ref[0].astype(compute_dtype)          # (tq, D)
    k = k_ref[0].astype(compute_dtype)          # (Sk, D)
    v = v_ref[0].astype(compute_dtype)          # (Sk, D)
    wq = wq_ref[...].astype(compute_dtype)      # (d_k, D)
    wk = wk_ref[...].astype(compute_dtype)      # (d_k, D)
    wv = wv_ref[...].astype(compute_dtype)      # (d_k, D)
    wot = wot_ref[...].astype(compute_dtype)    # (d_k, D)

    # Per-head projections (no in-kernel transpose), f32 accumulation on MXU.
    qh = lax.dot_general(q, wq, _CONTRACT_LAST,
                         preferred_element_type=jnp.float32)     # (tq, d_k)
    kh = lax.dot_general(k, wk, _CONTRACT_LAST,
                         preferred_element_type=jnp.float32)     # (Sk, d_k)
    vh = lax.dot_general(v, wv, _CONTRACT_LAST,
                         preferred_element_type=jnp.float32)     # (Sk, d_k)

    # Scale on the small (tq, d_k) tensor instead of the (tq, Sk) scores.
    qh = qh * scale

    # Scores: qh @ kh.T via last-dim contraction; softmax math stays f32.
    scores = lax.dot_general(qh.astype(compute_dtype), kh.astype(compute_dtype),
                             _CONTRACT_LAST,
                             preferred_element_type=jnp.float32)  # (tq, Sk)
    # TODO(synk): optional boolean attention mask (masked_fill -inf) not plumbed;
    # this matches the mask=None path of the PyTorch module.
    scores = scores - jnp.max(scores, axis=-1, keepdims=True)
    e = jnp.exp(scores)
    p = e * pl.reciprocal(jnp.sum(e, axis=-1, keepdims=True), approx=True)
    attn_ref[0, 0] = p.astype(attn_ref.dtype)

    # Context for this head, then its output-projection contribution.
    ctx = jnp.dot(p.astype(compute_dtype), vh.astype(compute_dtype),
                  preferred_element_type=jnp.float32)             # (tq, d_k)
    # context @ W_o.T == sum_h ctx_h @ (W_o.T)[h*d_k:(h+1)*d_k, :]
    acc_ref[...] += jnp.dot(ctx.astype(compute_dtype), wot,
                            preferred_element_type=jnp.float32)   # (tq, D)

    @pl.when(h == pl.num_programs(2) - 1)
    def _():
        out_ref[0] = acc_ref[...].astype(out_ref.dtype)


def _pick_q_tile(sq: int, target: int) -> int:
    """Largest multiple-of-8 divisor of sq that is <= target (else full sq)."""
    if sq <= target:
        return sq
    t = (min(target, sq) // 8) * 8
    while t >= 8:
        if sq % t == 0:
            return t
        t -= 8
    return sq


def multi_head_attention(query, key, value, w_q, w_k, w_v, w_o, *, num_heads,
                         compute_dtype=jnp.float32, block_q=256):
    """Pallas MHA forward. Returns (output, attention_weights)."""
    B, Sq, D = query.shape
    _, Sk, _ = key.shape
    assert D % num_heads == 0, "d_model must be divisible by num_heads"
    d_k = D // num_heads

    tq = _pick_q_tile(Sq, block_q)
    nq = Sq // tq

    # One-time weight transpose outside the kernel so the per-head W_o block is
    # a row-contiguous (d_k, D) slab (no transposes ever happen in the kernel).
    w_o_t = w_o.T

    kernel = functools.partial(_mha_kernel,
                               scale=1.0 / math.sqrt(d_k),
                               compute_dtype=compute_dtype)

    # Explicit scoped-VMEM budget: double-buffered pipeline buffers + f32
    # accumulator scratch, with headroom; clamped to 64 MiB (v7x physical).
    isz = jnp.dtype(query.dtype).itemsize
    wsz = jnp.dtype(w_q.dtype).itemsize
    in_bytes = (tq * D + 2 * Sk * D) * isz + 4 * d_k * D * wsz
    out_bytes = tq * D * isz + tq * Sk * 4
    vmem_est = 2 * (in_bytes + out_bytes) + tq * D * 4
    vmem_limit = int(min(max(2 * vmem_est + (8 << 20), 32 << 20), 64 << 20))

    out_shape = (
        jax.ShapeDtypeStruct((B, Sq, D), query.dtype),
        jax.ShapeDtypeStruct((B, num_heads, Sq, Sk), jnp.float32),
    )
    return pl.pallas_call(
        kernel,
        out_shape=out_shape,
        grid_spec=pltpu.PrefetchScalarGridSpec(
            num_scalar_prefetch=0,
            grid=(B, nq, num_heads),                               # head axis = reduction, last
            in_specs=[
                pl.BlockSpec((1, tq, D), lambda b, i, h: (b, i, 0)),   # query tile
                pl.BlockSpec((1, Sk, D), lambda b, i, h: (b, 0, 0)),   # key   (full Sk)
                pl.BlockSpec((1, Sk, D), lambda b, i, h: (b, 0, 0)),   # value (full Sk)
                pl.BlockSpec((d_k, D), lambda b, i, h: (h, 0)),        # W_q rows of head h
                pl.BlockSpec((d_k, D), lambda b, i, h: (h, 0)),        # W_k rows of head h
                pl.BlockSpec((d_k, D), lambda b, i, h: (h, 0)),        # W_v rows of head h
                pl.BlockSpec((d_k, D), lambda b, i, h: (h, 0)),        # (W_o.T) rows of head h
            ],
            out_specs=[
                pl.BlockSpec((1, tq, D), lambda b, i, h: (b, i, 0)),       # output
                pl.BlockSpec((1, 1, tq, Sk), lambda b, i, h: (b, h, i, 0)),  # attn weights
            ],
            scratch_shapes=[pltpu.VMEM((tq, D), jnp.float32)],         # output-proj accumulator
        ),
        compiler_params=pltpu.CompilerParams(
            dimension_semantics=("parallel", "parallel", "arbitrary"),
            vmem_limit_bytes=vmem_limit),
    )(query, key, value, w_q, w_k, w_v, w_o_t)


def _reference_mha(query, key, value, w_q, w_k, w_v, w_o, *, num_heads):
    """Pure-JAX reference mirroring the PyTorch module (mask=None)."""
    B, Sq, D = query.shape
    _, Sk, _ = key.shape
    d_k = D // num_heads

    def split(x, S):
        return x.reshape(B, S, num_heads, d_k).transpose(0, 2, 1, 3)

    qp = split(query @ w_q.T, Sq)
    kp = split(key @ w_k.T, Sk)
    vp = split(value @ w_v.T, Sk)
    scores = jnp.einsum("bhqd,bhkd->bhqk", qp, kp) / math.sqrt(d_k)
    attn = jax.nn.softmax(scores, axis=-1)
    ctx = jnp.einsum("bhqk,bhkd->bhqd", attn, vp)
    ctx = ctx.transpose(0, 2, 1, 3).reshape(B, Sq, D)
    return ctx @ w_o.T, attn


if __name__ == "__main__":
    # Small deterministic problem: batch=2, seq=8, d_model=32, heads=4 (d_k=8)
    B, S, D, H = 2, 8, 32, 4

    key0 = jax.random.PRNGKey(0)
    kq, kk, kv, kwq, kwk, kwv, kwo = jax.random.split(key0, 7)

    query = jax.random.normal(kq, (B, S, D), dtype=jnp.float32)
    key_t = jax.random.normal(kk, (B, S, D), dtype=jnp.float32)
    value = jax.random.normal(kv, (B, S, D), dtype=jnp.float32)

    # Deterministic Linear weights (PyTorch-style uniform(-1/sqrt(D), 1/sqrt(D)))
    bound = 1.0 / math.sqrt(D)
    w_q = jax.random.uniform(kwq, (D, D), jnp.float32, -bound, bound)
    w_k = jax.random.uniform(kwk, (D, D), jnp.float32, -bound, bound)
    w_v = jax.random.uniform(kwv, (D, D), jnp.float32, -bound, bound)
    w_o = jax.random.uniform(kwo, (D, D), jnp.float32, -bound, bound)

    ref_out, ref_attn = _reference_mha(query, key_t, value,
                                       w_q, w_k, w_v, w_o, num_heads=H)

    # Default path: f32 MXU inputs, f32 accumulation.
    out, attn = multi_head_attention(query, key_t, value,
                                     w_q, w_k, w_v, w_o, num_heads=H)
    out = jax.block_until_ready(out)
    attn = jax.block_until_ready(attn)
    assert out.shape == (B, S, D)
    assert attn.shape == (B, H, S, S)
    assert jnp.allclose(out, ref_out, atol=5e-3, rtol=5e-3)
    assert jnp.allclose(attn, ref_attn, atol=5e-3, rtol=5e-3)

    # bf16-MXU / f32-accumulate fast path (looser tolerance).
    out_bf, attn_bf = multi_head_attention(query, key_t, value,
                                           w_q, w_k, w_v, w_o, num_heads=H,
                                           compute_dtype=jnp.bfloat16)
    out_bf = jax.block_until_ready(out_bf)
    attn_bf = jax.block_until_ready(attn_bf)
    assert jnp.allclose(out_bf, ref_out, atol=7.5e-2, rtol=7.5e-2)
    assert jnp.allclose(attn_bf, ref_attn, atol=5e-2, rtol=5e-2)

    print("KERNEL_OK")
</pallas_src>

<mosaic_0001>
module attributes {stable_mosaic.version = 11 : i64} {
  func.func @_mha_kernel(%arg0: i32, %arg1: i32, %arg2: i32, %arg3: memref<1x8x32xf32, #tpu.memory_space<vmem>>, %arg4: memref<1x8x32xf32, #tpu.memory_space<vmem>>, %arg5: memref<1x8x32xf32, #tpu.memory_space<vmem>>, %arg6: memref<8x32xf32, #tpu.memory_space<vmem>>, %arg7: memref<8x32xf32, #tpu.memory_space<vmem>>, %arg8: memref<8x32xf32, #tpu.memory_space<vmem>>, %arg9: memref<8x32xf32, #tpu.memory_space<vmem>>, %arg10: memref<1x8x32xf32, #tpu.memory_space<vmem>>, %arg11: memref<1x1x8x8xf32, #tpu.memory_space<vmem>>, %arg12: memref<8x32xf32, #tpu.memory_space<vmem>>) attributes {dimension_semantics = [#tpu.dimension_semantics<parallel>, #tpu.dimension_semantics<parallel>, #tpu.dimension_semantics<arbitrary>], iteration_bounds = array<i64: 2, 1, 4>, scalar_prefetch = 0 : i64, scratch_operands = 1 : i64, tpu.core_type = #tpu.core_type<tc>, window_params = [{transform_indices = @transform_0, window_bounds = array<i64: 1, 8, 32>}, {transform_indices = @transform_1, window_bounds = array<i64: 1, 8, 32>}, {transform_indices = @transform_2, window_bounds = array<i64: 1, 8, 32>}, {transform_indices = @transform_3, window_bounds = array<i64: 8, 32>}, {transform_indices = @transform_4, window_bounds = array<i64: 8, 32>}, {transform_indices = @transform_5, window_bounds = array<i64: 8, 32>}, {transform_indices = @transform_6, window_bounds = array<i64: 8, 32>}, {transform_indices = @transform_7, window_bounds = array<i64: 1, 8, 32>}, {transform_indices = @transform_8, window_bounds = array<i64: 1, 1, 8, 8>}]} {
    %c0_i32 = arith.constant 0 : i32
    %0 = arith.cmpi eq, %arg2, %c0_i32 : i32
    %1 = arith.extui %0 : i1 to i32
    %c0_i32_0 = arith.constant 0 : i32
    %2 = arith.cmpi ne, %1, %c0_i32_0 : i32
    scf.if %2 {
      %cst_34 = arith.constant 0.000000e+00 : f32
      %40 = vector.broadcast %cst_34 : f32 to vector<8x32xf32>
      %c0_35 = arith.constant 0 : index
      %c0_36 = arith.constant 0 : index
      %41 = vector.load %arg12[%c0_35, %c0_36] : memref<8x32xf32, #tpu.memory_space<vmem>>, vector<8x32xf32>
      tpu.vector_store %arg12[%c0_35, %c0_36], %40 {strides = array<i32>} : memref<8x32xf32, #tpu.memory_space<vmem>>, vector<8x32xf32>,
    } else {
    }
    %c0 = arith.constant 0 : index
    %c0_1 = arith.constant 0 : index
    %c0_2 = arith.constant 0 : index
    %3 = vector.load %arg3[%c0, %c0_1, %c0_2] : memref<1x8x32xf32, #tpu.memory_space<vmem>>, vector<1x8x32xf32>
    %4 = vector.shape_cast %3 : vector<1x8x32xf32> to vector<8x32xf32>
    %c0_3 = arith.constant 0 : index
    %c0_4 = arith.constant 0 : index
    %c0_5 = arith.constant 0 : index
    %5 = vector.load %arg4[%c0_3, %c0_4, %c0_5] : memref<1x8x32xf32, #tpu.memory_space<vmem>>, vector<1x8x32xf32>
    %6 = vector.shape_cast %5 : vector<1x8x32xf32> to vector<8x32xf32>
    %c0_6 = arith.constant 0 : index
    %c0_7 = arith.constant 0 : index
    %c0_8 = arith.constant 0 : index
    %7 = vector.load %arg5[%c0_6, %c0_7, %c0_8] : memref<1x8x32xf32, #tpu.memory_space<vmem>>, vector<1x8x32xf32>
    %8 = vector.shape_cast %7 : vector<1x8x32xf32> to vector<8x32xf32>
    %c0_9 = arith.constant 0 : index
    %c0_10 = arith.constant 0 : index
    %9 = vector.load %arg6[%c0_9, %c0_10] : memref<8x32xf32, #tpu.memory_space<vmem>>, vector<8x32xf32>
    %c0_11 = arith.constant 0 : index
    %c0_12 = arith.constant 0 : index
    %10 = vector.load %arg7[%c0_11, %c0_12] : memref<8x32xf32, #tpu.memory_space<vmem>>, vector<8x32xf32>
    %c0_13 = arith.constant 0 : index
    %c0_14 = arith.constant 0 : index
    %11 = vector.load %arg8[%c0_13, %c0_14] : memref<8x32xf32, #tpu.memory_space<vmem>>, vector<8x32xf32>
    %c0_15 = arith.constant 0 : index
    %c0_16 = arith.constant 0 : index
    %12 = vector.load %arg9[%c0_15, %c0_16] : memref<8x32xf32, #tpu.memory_space<vmem>>, vector<8x32xf32>
    %cst = arith.constant dense<0.000000e+00> : vector<8x8xf32>
    %13 = tpu.matmul %4, %9, %cst {dimension_numbers = #tpu.dot_dimension_numbers<[1], [1], [0], [0], [0, 0, 1, 0], [], []>} : vector<8x32xf32>, vector<8x32xf32>, vector<8x8xf32> -> vector<8x8xf32>
    %cst_17 = arith.constant dense<0.000000e+00> : vector<8x8xf32>
    %14 = tpu.matmul %6, %10, %cst_17 {dimension_numbers = #tpu.dot_dimension_numbers<[1], [1], [0], [0], [0, 0, 1, 0], [], []>} : vector<8x32xf32>, vector<8x32xf32>, vector<8x8xf32> -> vector<8x8xf32>
    %cst_18 = arith.constant dense<0.000000e+00> : vector<8x8xf32>
    %15 = tpu.matmul %8, %11, %cst_18 {dimension_numbers = #tpu.dot_dimension_numbers<[1], [1], [0], [0], [0, 0, 1, 0], [], []>} : vector<8x32xf32>, vector<8x32xf32>, vector<8x8xf32> -> vector<8x8xf32>
    %cst_19 = arith.constant 0.353553385 : f32
    %16 = vector.broadcast %cst_19 : f32 to vector<8x8xf32>
    %17 = arith.mulf %13, %16 : vector<8x8xf32>
    %cst_20 = arith.constant dense<0.000000e+00> : vector<8x8xf32>
    %18 = tpu.matmul %17, %14, %cst_20 {dimension_numbers = #tpu.dot_dimension_numbers<[1], [1], [0], [0], [0, 0, 1, 0], [], []>} : vector<8x8xf32>, vector<8x8xf32>, vector<8x8xf32> -> vector<8x8xf32>
    %cst_21 = arith.constant dense<0xFF800000> : vector<8xf32>
    %19 = vector.multi_reduction <maximumf>, %18, %cst_21 [1] : vector<8x8xf32> to vector<8xf32>
    %20 = vector.shape_cast %19 : vector<8xf32> to vector<8x1xf32>
    %21 = vector.broadcast %20 : vector<8x1xf32> to vector<8x8xf32>
    %22 = arith.subf %18, %21 : vector<8x8xf32>
    %23 = math.exp %22 : vector<8x8xf32>
    %cst_22 = arith.constant dense<0.000000e+00> : vector<8xf32>
    %24 = vector.multi_reduction <add>, %23, %cst_22 [1] : vector<8x8xf32> to vector<8xf32>
    %25 = vector.shape_cast %24 : vector<8xf32> to vector<8x1xf32>
    %26 = tpu.reciprocal %25 {approx = true} : vector<8x1xf32> -> vector<8x1xf32>
    %27 = vector.broadcast %26 : vector<8x1xf32> to vector<8x8xf32>
    %28 = arith.mulf %23, %27 : vector<8x8xf32>
    %c0_23 = arith.constant 0 : index
    %c0_24 = arith.constant 0 : index
    %c0_25 = arith.constant 0 : index
    %c0_26 = arith.constant 0 : index
    %29 = vector.load %arg11[%c0_23, %c0_24, %c0_25, %c0_26] : memref<1x1x8x8xf32, #tpu.memory_space<vmem>>, vector<1x1x8x8xf32>
    %30 = vector.shape_cast %29 : vector<1x1x8x8xf32> to vector<8x8xf32>
    %31 = vector.shape_cast %28 : vector<8x8xf32> to vector<1x1x8x8xf32>
    tpu.vector_store %arg11[%c0_23, %c0_24, %c0_25, %c0_26], %31 {strides = array<i32>} : memref<1x1x8x8xf32, #tpu.memory_space<vmem>>, vector<1x1x8x8xf32>,
    %cst_27 = arith.constant dense<0.000000e+00> : vector<8x8xf32>
    %32 = tpu.matmul %28, %15, %cst_27 {dimension_numbers = #tpu.dot_dimension_numbers<[1], [0], [0], [1], [0, 0, 1, 1], [], []>} : vector<8x8xf32>, vector<8x8xf32>, vector<8x8xf32> -> vector<8x8xf32>
    %c0_28 = arith.constant 0 : index
    %c0_29 = arith.constant 0 : index
    %33 = vector.load %arg12[%c0_28, %c0_29] : memref<8x32xf32, #tpu.memory_space<vmem>>, vector<8x32xf32>
    %cst_30 = arith.constant dense<0.000000e+00> : vector<8x32xf32>
    %34 = tpu.matmul %32, %12, %cst_30 {dimension_numbers = #tpu.dot_dimension_numbers<[1], [0], [0], [1], [0, 0, 1, 1], [], []>} : vector<8x8xf32>, vector<8x32xf32>, vector<8x32xf32> -> vector<8x32xf32>
    %35 = arith.addf %33, %34 : vector<8x32xf32>
    %c0_31 = arith.constant 0 : index
    %c0_32 = arith.constant 0 : index
    %36 = vector.load %arg12[%c0_31, %c0_32] : memref<8x32xf32, #tpu.memory_space<vmem>>, vector<8x32xf32>
    tpu.vector_store %arg12[%c0_31, %c0_32], %35 {strides = array<i32>} : memref<8x32xf32, #tpu.memory_space<vmem>>, vector<8x32xf32>,
    %c3_i32 = arith.constant 3 : i32
    %37 = arith.cmpi eq, %arg2, %c3_i32 : i32
    %38 = arith.extui %37 : i1 to i32
    %c0_i32_33 = arith.constant 0 : i32
    %39 = arith.cmpi ne, %38, %c0_i32_33 : i32
    scf.if %39 {
      %c0_34 = arith.constant 0 : index
      %c0_35 = arith.constant 0 : index
      %40 = vector.load %arg12[%c0_34, %c0_35] : memref<8x32xf32, #tpu.memory_space<vmem>>, vector<8x32xf32>
      %c0_36 = arith.constant 0 : index
      %c0_37 = arith.constant 0 : index
      %c0_38 = arith.constant 0 : index
      %41 = vector.load %arg10[%c0_36, %c0_37, %c0_38] : memref<1x8x32xf32, #tpu.memory_space<vmem>>, vector<1x8x32xf32>
      %42 = vector.shape_cast %41 : vector<1x8x32xf32> to vector<8x32xf32>
      %43 = vector.shape_cast %40 : vector<8x32xf32> to vector<1x8x32xf32>
      tpu.vector_store %arg10[%c0_36, %c0_37, %c0_38], %43 {strides = array<i32>} : memref<1x8x32xf32, #tpu.memory_space<vmem>>, vector<1x8x32xf32>,
    } else {
    }
    return
  }
  func.func @transform_0(%arg0: i32, %arg1: i32, %arg2: i32) -> (i32, i32, i32) {
    %c0_i32 = arith.constant 0 : i32
    %c0_i32_0 = arith.constant 0 : i32
    return %arg0, %arg1, %c0_i32 : i32, i32, i32
  }
  func.func @transform_1(%arg0: i32, %arg1: i32, %arg2: i32) -> (i32, i32, i32) {
    %c0_i32 = arith.constant 0 : i32
    %c0_i32_0 = arith.constant 0 : i32
    %c0_i32_1 = arith.constant 0 : i32
    return %arg0, %c0_i32, %c0_i32_0 : i32, i32, i32
  }
  func.func @transform_2(%arg0: i32, %arg1: i32, %arg2: i32) -> (i32, i32, i32) {
    %c0_i32 = arith.constant 0 : i32
    %c0_i32_0 = arith.constant 0 : i32
    %c0_i32_1 = arith.constant 0 : i32
    return %arg0, %c0_i32, %c0_i32_0 : i32, i32, i32
  }
  func.func @transform_3(%arg0: i32, %arg1: i32, %arg2: i32) -> (i32, i32) {
    %c0_i32 = arith.constant 0 : i32
    %c0_i32_0 = arith.constant 0 : i32
    return %arg2, %c0_i32 : i32, i32
  }
  func.func @transform_4(%arg0: i32, %arg1: i32, %arg2: i32) -> (i32, i32) {
    %c0_i32 = arith.constant 0 : i32
    %c0_i32_0 = arith.constant 0 : i32
    return %arg2, %c0_i32 : i32, i32
  }
  func.func @transform_5(%arg0: i32, %arg1: i32, %arg2: i32) -> (i32, i32) {
    %c0_i32 = arith.constant 0 : i32
    %c0_i32_0 = arith.constant 0 : i32
    return %arg2, %c0_i32 : i32, i32
  }
  func.func @transform_6(%arg0: i32, %arg1: i32, %arg2: i32) -> (i32, i32) {
    %c0_i32 = arith.constant 0 : i32
    %c0_i32_0 = arith.constant 0 : i32
    return %arg2, %c0_i32 : i32, i32
  }
  func.func @transform_7(%arg0: i32, %arg1: i32, %arg2: i32) -> (i32, i32, i32) {
    %c0_i32 = arith.constant 0 : i32
    %c0_i32_0 = arith.constant 0 : i32
    return %arg0, %arg1, %c0_i32 : i32, i32, i32
  }
  func.func @transform_8(%arg0: i32, %arg1: i32, %arg2: i32) -> (i32, i32, i32, i32) {
    %c0_i32 = arith.constant 0 : i32
    %c0_i32_0 = arith.constant 0 : i32
    return %arg0, %arg2, %arg1, %c0_i32 : i32, i32, i32, i32
  }
}

</mosaic_0001>

<bundles_post_ra>
// kernel: tpu_custom_call.1
= control target key start
LH: loop header
LB: loop body
LE: loop exit
PB: predicated region body
PF: predicated region fallthrough
CT: control target
= control target key end

     0   :  { %s2135_s0 = inlined_call_operand.hbm [shape: f32[2,8,32], index: 0, kind: input, shape index: {}]   ;;  %s2136_s1 = inlined_call_operand.hbm [shape: f32[2,8,32], index: 1, kind: input, shape index: {}]   ;;  %s2137_s2 = inlined_call_operand.hbm [shape: f32[2,8,32], index: 2, kind: input, shape index: {}]   ;;  %s2138_s3 = inlined_call_operand.hbm [shape: f32[32,32], index: 3, kind: input, shape index: {}]   ;;  %s2139_s4 = inlined_call_operand.hbm [shape: f32[32,32], index: 4, kind: input, shape index: {}]   ;;  %s2140_s5 = inlined_call_operand.hbm [shape: f32[32,32], index: 5, kind: input, shape index: {}]   ;;  %s2141_s6 = inlined_call_operand.hbm [shape: f32[32,32], index: 6, kind: input, shape index: {}]   ;;  %s2142_s7 = inlined_call_operand.hbm [shape: f32[2,8,32], index: 7, kind: output, shape index: {0}]   ;;  %s2143_s8 = inlined_call_operand.hbm [shape: f32[2,4,8,8], index: 8, kind: output, shape index: {1}]  }
   0x1   :  { %2176 = sst [smem:[#allocation43_spill]] %s2135_s0 }
   0x2   :  { %2177 = sst [smem:[#allocation44_spill]] %s2136_s1 }
   0x3   :  { %2178 = sst [smem:[#allocation45_spill]] %s2137_s2 }
   0x4   :  { %2179 = sst [smem:[#allocation46_spill]] %s2138_s3 }
   0x5   :  { %2180 = sst [smem:[#allocation47_spill]] %s2139_s4 }
   0x6   :  { %2181 = sst [smem:[#allocation48_spill]] %s2140_s5 }
   0x7   :  { %2182 = sst [smem:[#allocation49_spill]] %s2141_s6 }
   0x8   :  { %2183 = sst [smem:[#allocation50_spill]] %s2142_s7 }
   0x9   :  { %2184 = sst [smem:[#allocation51_spill]] %s2143_s8 }
   0xa   :  { %14 = vsyncpa [#allocation4], 0 }
   0xb   :  { %16 = vsyncpa [#allocation4 + $0x1], 0 }
   0xc   :  { %17 = vsyncpa [#allocation7], 0 }
   0xd   :  { %19 = vsyncpa [#allocation7 + $0x1], 0 }
   0xe   :  { %20 = vsyncpa [#allocation10], 0 }
   0xf   :  { %22 = vsyncpa [#allocation10 + $0x1], 0 }
  0x10   :  { %23 = vsyncpa [#allocation13], 0 }
  0x11   :  { %25 = vsyncpa [#allocation13 + $0x1], 0 }
  0x12   :  { %26 = vsyncpa [#allocation5], 0 }
  0x13   :  { %28 = vsyncpa [#allocation5 + $0x1], 0 }
  0x14   :  { %29 = vsyncpa [#allocation17], 0 }
  0x15   :  { %31 = vsyncpa [#allocation17 + $0x1], 0  ;;  %s1725_s27 = smov 0   ;;  %s1727_s28 = smov 0  }
  0x16   :  { %s1729_s29 = smov 0   ;;  %s1731_s30 = smov 0  }
  0x17   :  { %s1733_s9 = smov 0   ;;  %s1735_s10 = smov 0  }
  0x18   :  { %s1737_s11 = smov 0   ;;  %s1739_s12 = smov 0  }
  0x19   :  { %s1741_s13 = smov 0   ;;  %s1743_s14 = smov 0  }
  0x1a   :  { %s1745_s15 = smov 0   ;;  %s1747_s16 = smov 0  }
  0x1b   :  { %s1749_s17 = smov 0   ;;  %s1751_s18 = smov 0  }
  0x1c LB: > { %2185 = sst [smem:[#allocation24_spill]] %s1625_s27  ;;  %s1794_s19 = sadd.s32 4294967295, %s1677_s18   ;;  %s1677_s18 = sphi %s1751_s18, %s2272_s18   ;;  %s1673_s17 = sphi %s1749_s17, %s2271_s17   ;;  %s1669_s16 = sphi %s1747_s16, %s2270_s16   ;;  %s1665_s15 = sphi %s1745_s15, %s2269_s15   ;;  %s1661_s14 = sphi %s1743_s14, %s2259_s14   ;;  %s1657_s13 = sphi %s1741_s13, %s2268_s13   ;;  %s1653_s12 = sphi %s1739_s12, %s2267_s12   ;;  %s1649_s11 = sphi %s1737_s11, %s2257_s11   ;;  %s1645_s10 = sphi %s1735_s10, %s2266_s10   ;;  %s1641_s9 = sphi %s1733_s9, %s2265_s9   ;;  %s1637_s30 = sphi %s1731_s30, %s2256_s30   ;;  %s1633_s29 = sphi %s1729_s29, %s2264_s29   ;;  %s1629_s28 = sphi %s1727_s28, %s2263_s28   ;;  %s1625_s27 = sphi %s1725_s27, %s2255_s27  }
  0x1d   : > { %2186 = sst [smem:[#allocation25_spill]] %s1629_s28  ;;  %s1065_s20 = sadd.s32 4294967294, %s1677_s18  }
  0x1e   : > { %2187 = sst [smem:[#allocation26_spill]] %s1641_s9  ;;  %p72_p0 = scmp.ne.s32.totalorder %s1657_s13, %s1653_s12 }
  0x1f   : > { %2188 = sst [smem:[#allocation27_spill]] %s1649_s11  ;;  %p73_p1 = scmp.eq.s32.totalorder %s1677_s18, 0 }
  0x20   : > { %2189 = sst [smem:[#allocation28_spill]] %s1653_s12  ;;  %p78_p2 = scmp.ne.s32.totalorder %s1653_s12, %s1649_s11 }
  0x21   : > { %2190 = sst [smem:[#allocation29_spill]] %s1661_s14  ;;  %p79_p3 = scmp.eq.s32.totalorder %s1794_s19, 0 }
  0x22   : > { %2191 = sst [smem:[#allocation30_spill]] %s1665_s15  ;;  %p1805_p4 = por %p73_p1, %p72_p0 }
  0x23   : > { %2192 = sst [smem:[#allocation31_spill]] %s1669_s16  ;;  %p150_p5 = scmp.ne.s32.totalorder %s1645_s10, %s1641_s9 }
  0x24   : > { %2193 = sst [smem:[#allocation32_spill]] %s1677_s18  ;;  %p1811_p6 = por %p79_p3, %p78_p2 }
  0x25   : > { %2194 = sst [smem:[#allocation33_spill]] %s1794_s19  ;;  %p156_p7 = scmp.ne.s32.totalorder %s1641_s9, %s1637_s30 }
  0x26   : > { %s2195_s23 = scalar_select %p1805_p4, 1, 0 }
  0x27   : > { %s2196_s24 = scalar_select %p1811_p6, 1, 0 }
  0x28   : > { %p1816_p8 = por %p150_p5, %p73_p1  ;;  %p260_p9 = scmp.eq.s32.totalorder %s1794_s19, 7 }
  0x29   : > { %2197 = sst [smem:[#allocation34_spill]] %s2196_s24  ;;  %p1821_p10 = por %p156_p7, %p79_p3 }
  0x2a   : > { %p266_p11 = scmp.eq.s32.totalorder %s1065_s20, 7  ;;  %p1825_p12 = por %p260_p9, %p72_p0 }
  0x2b   : > { %s2199_s26 = scalar_select %p1821_p10, 1, 0 }
  0x2c   : > { %s2201_s22 = scalar_select %p1825_p12, 1, 0 }
  0x2d   : > { %2200 = sst [smem:[#allocation35_spill]] %s2199_s26  ;;  %p289_p13 = scmp.ne.s32.totalorder %s1633_s29, %s1629_s28 }
  0x2e   : > { %2202 = sst [smem:[#allocation36_spill]] %s2201_s22  ;;  %p1831_p4 = por %p266_p11, %p78_p2 }
  0x2f   : > { %p295_p1 = scmp.ne.s32.totalorder %s1629_s28, %s1625_s27  ;;  %p1837_p5 = por %p289_p13, %p260_p9 }
  0x30   : > { %s2203_s21 = scalar_select %p1831_p4, 1, 0 }
  0x31   : > { %s2205_s30 = scalar_select %p1837_p5, 1, 0 }
  0x32   : > { %2204 = sst [smem:[#allocation37_spill]] %s2203_s21  ;;  %p1841_p3 = por %p295_p1, %p266_p11 }
  0x33   : > { %2206 = sst [smem:[#allocation38_spill]] %s2205_s30  ;;  %p1158_p0 = scmp.lt.s32.totalorder %s1677_s18, 8 }
  0x34   : > { %s2207_s11 = scalar_select %p1841_p3, 1, 0 }
  0x35   : > { %s2154_s20 = sand.u32 1, %s1657_s13   ;;  %s1848_s8 = sshll.u32 %s1673_s17, 3 }
  0x36   : > { %2208 = sst [smem:[#allocation39_spill]] %s2207_s11  ;;  %s1852_s21 = sshll.u32 %s2154_s20, 3 }
  0x37   : > { %p2209_p2 = scmp.ne.s32.totalorder %s2195_s23, 0  ;;  %s1861_s11 = sand.u32 1, %s1677_s18  }
  0x38   : > { %s2211_s1 = sld [smem:[#allocation44_spill]]  ;;  %s340_s20 = scalar_lea.vmem [#allocation6], %s1852_s21 }
  0x39   : > { %p1856_p7 = pnand %p1158_p0, %p2209_p2  ;;  %s348_s15 = sshll.u32 %s340_s20, 4  ;;  %s349_s15 = int_to_ptr.vmem [resolvable:$true] %s348_s15 }
  0x3a   : > { %p1870_p9 = pnand %p1158_p0, %p1816_p8  ;;  %s2158_s28 = scalar_lea.sflag [#allocation7], %s1861_s11 }
  0x3b   : > { %p1082_p11 = scmp.ge.s32.totalorder %s1677_s18, 1  ;;  %p448_p13 = scmp.lt.s32.totalorder %s1677_s18, 9 }
  0x3c   : > { %s143_s7 = sadd.s32 1, %s1645_s10  ;;  %s49_s30 = sadd.s32 1, %s1669_s16 }
  0x3d   : > { %p1882_p1 = pnand %p1082_p11, %p448_p13  ;;  %p50_p2 = scmp.ge.s32.totalorder %s49_s30, 4 }
  0x3e   : > { %s344_s22 = scalar_lea.hbm %s2211_s1, %s1848_s8  ;;  %s279_s25 = sadd.s32 1, %s1633_s29 }
  0x3f   : > { %s346_s23 = sshll.u32 %s344_s22, 4  ;;  %s376_s20 = sand.u32 1, %s1645_s10   ;;  %s347_s23 = int_to_ptr.hbm [resolvable:$true] %s346_s23 }
  0x40   : > { %1135 = dma.hbm_to_vmem [thread:$0]  (!%p1856_p7), %s347_s23, 128, %s349_s15, %s2158_s28  }
  0x41   : > { %s2213_s22 = scalar_select %p1882_p1, 1, 0 }
  0x42   : > { %s2274_s30 = smov (%p50_p2, %s49_s30), 0  ;;  %s2216_s1 = sadd.s32 1, %s1673_s17 }
  0x43   : > { %2214 = sst [smem:[#allocation40_spill]] %s2213_s22  ;;  %s2276_s1 = smov (!%p50_p2, %s2216_s1), %s1673_s17 }
  0x44   : > { %2215 = sst [smem:[#allocation41_spill]] %s2274_s30  ;;  %s140_s15 = ssub.s32 %s1669_s16, %s2274_s30 }
  0x45   : > { %s1896_s23 = sshll.u32 %s376_s20, 3  ;;  %p58_p8 = scmp.ge.s32.totalorder %s2276_s1, 2 }
  0x46   : > { %p141_p0 = scmp.eq.s32.totalorder %s140_s15, 0  ;;  %s1899_s28 = sshll.u32 %s1669_s16, 3 }
  0x47   : > { %s2278_s1 = smov (%p58_p8, %s2276_s1), 0  ;;  %s2218_s3 = sld [smem:[#allocation46_spill]] }
  0x48   : > { %2217 = sst [smem:[#allocation42_spill]] %s2278_s1  ;;  %s60_s26 = ssub.s32 %s1673_s17, %s2278_s1 }
  0x49   : > { %s1904_s18 = scalar_select %p141_p0, %s1645_s10, %s143_s7  }
  0x4a   : > { %p63_p11 = scmp.eq.s32.totalorder %s60_s26, 0  ;;  %s274_s19 = sor.u32 %s140_s15, %s60_s26 }
  0x4b   : > { %p277_p13 = scmp.eq.s32.totalorder %s274_s19, 0  ;;  %s2219_s24 = sadd.s32 1, %s1657_s13 }
  0x4c   : > { %s1915_s12 = scalar_select %p63_p11, %s1657_s13, %s2219_s24  }
  0x4d   : > { %s382_s20 = scalar_lea.hbm %s2218_s3, %s1899_s28  ;;  %s378_s7 = scalar_lea.vmem [#allocation9], %s1896_s23 }
  0x4e   : > { %s384_s16 = sshll.u32 %s382_s20, 4  ;;  %s386_s1 = sshll.u32 %s378_s7, 4  ;;  %s385_s16 = int_to_ptr.hbm [resolvable:$true] %s384_s16  ;;  %s387_s1 = int_to_ptr.vmem [resolvable:$true] %s386_s1 }
  0x4f   : > { %s1918_s22 = scalar_select %p277_p13, %s1633_s29, %s279_s25  }
  0x50   : > { %s2172_s9 = scalar_lea.sflag [#allocation10], %s1861_s11  ;;  %s2220_s5 = sld [smem:[#allocation48_spill]] }
  0x51   : > { %1141 = dma.hbm_to_vmem [thread:$0]  (!%p1870_p9), %s385_s16, 128, %s387_s1, %s2172_s9  }
  0x52   : > { %s416_s25 = scalar_lea.vmem [#allocation12], %s1896_s23  ;;  %s2173_s20 = scalar_lea.sflag [#allocation13], %s1861_s11 }
  0x53   : > { %s424_s15 = sshll.u32 %s416_s25, 4  ;;  %s2221_s0 = sld [smem:[#allocation43_spill]]  ;;  %s425_s15 = int_to_ptr.vmem [resolvable:$true] %s424_s15 }
  0x54   : > { %s320_s19 = scalar_lea.vmem [#allocation3], %s1852_s21  ;;  %s2222_s25 = sand.u32 1, %s1657_s13  }
  0x55   : > { %s329_s26 = sshll.u32 %s320_s19, 4  ;;  %s317_s9 = scalar_lea.sflag [#allocation4], %s2222_s25  ;;  %s330_s26 = int_to_ptr.vmem [resolvable:$true] %s329_s26 }
  0x56   : > { %s420_s30 = scalar_lea.hbm %s2220_s5, %s1899_s28  ;;  %s2223_s2 = sld [smem:[#allocation45_spill]] }
  0x57   : > { %s422_s24 = sshll.u32 %s420_s30, 4  ;;  %s359_s7 = scalar_lea.vmem [#allocation8], %s1852_s21  ;;  %s423_s24 = int_to_ptr.hbm [resolvable:$true] %s422_s24 }
  0x58   : > { %1147 = dma.hbm_to_vmem [thread:$0]  (!%p1870_p9), %s423_s24, 128, %s425_s15, %s2173_s20  }
  0x59   : > { %s325_s16 = scalar_lea.hbm %s2221_s0, %s1848_s8  ;;  %s367_s1 = sshll.u32 %s359_s7, 4  ;;  %s368_s1 = int_to_ptr.vmem [resolvable:$true] %s367_s1 }
  0x5a   : > { %s327_s30 = sshll.u32 %s325_s16, 4  ;;  %s2224_s16 = scalar_lea.sflag [#allocation7], %s1861_s11  ;;  %s328_s30 = int_to_ptr.hbm [resolvable:$true] %s327_s30 }
  0x5b   : > { %1132 = dma.hbm_to_vmem [thread:$0]  (!%p1856_p7), %s328_s30, 128, %s330_s26, %s317_s9  }
  0x5c   : > { %s363_s15 = scalar_lea.hbm %s2223_s2, %s1848_s8  ;;  %s2225_s4 = sld [smem:[#allocation47_spill]] }
  0x5d   : > { %s365_s20 = sshll.u32 %s363_s15, 4  ;;  %s397_s9 = scalar_lea.vmem [#allocation11], %s1896_s23  ;;  %s366_s20 = int_to_ptr.hbm [resolvable:$true] %s365_s20 }
  0x5e   : > { %1138 = dma.hbm_to_vmem [thread:$0]  (!%p1856_p7), %s366_s20, 128, %s368_s1, %s2224_s16  }
  0x5f   : > { %s405_s26 = sshll.u32 %s397_s9, 4  ;;  %s2226_s3 = scalar_lea.sflag [#allocation10], %s1861_s11  ;;  %s406_s26 = int_to_ptr.vmem [resolvable:$true] %s405_s26 }
  0x60   : > { %s2227_s6 = sld [smem:[#allocation49_spill]]  ;;  %s435_s15 = scalar_lea.vmem [#allocation14], %s1896_s23 }
  0x61   : > { %s443_s27 = sshll.u32 %s435_s15, 4  ;;  %s2228_s20 = scalar_lea.sflag [#allocation13], %s1861_s11  ;;  %s444_s27 = int_to_ptr.vmem [resolvable:$true] %s443_s27 }
  0x62   : > { %s401_s0 = scalar_lea.hbm %s2225_s4, %s1899_s28 }
  0x63   : > { %s403_s30 = sshll.u32 %s401_s0, 4  ;;  %s2230_s0 = sld [smem:[#allocation28_spill]] (!%p1882_p1)  ;;  %s404_s30 = int_to_ptr.hbm [resolvable:$true] %s403_s30 }
  0x64   : > { %1144 = dma.hbm_to_vmem [thread:$0]  (!%p1870_p9), %s404_s30, 128, %s406_s26, %s2226_s3  }
  0x65   : > { %452 = sbr.rel (%p1882_p1) target bundleno = 972 (0x3cc), region = 48 }
  0x66   : > { %s439_s24 = scalar_lea.hbm %s2227_s6, %s1899_s28 }
  0x67   : > { %s441_s7 = sshll.u32 %s439_s24, 4  ;;  %s442_s7 = int_to_ptr.hbm [resolvable:$true] %s441_s7 }
  0x68   : > { %1150 = dma.hbm_to_vmem [thread:$0]  (!%p1870_p9), %s442_s7, 128, %s444_s27, %s2228_s20  }
  0x69   : > { %s1975_s19 = sand.u32 (!%p1882_p1), 1, %s2230_s0  }
  0x6a   : > { %s1978_s25 = sshll.u32 %s1975_s19, 3  ;;  %s455_s28 = scalar_lea.sflag [#allocation4], %s1975_s19 }
  0x6b   : > { %s458_s23 = scalar_lea.vmem [#allocation3], %s1978_s25 }
  0x6c   : > { %1600 = dma.done.wait (%p1811_p6), %s455_s28, 128  }
  0x6d   : > { %1602 = vsyncadd (%p1811_p6), %s455_s28, 4294967168  ;;  %s2232_s11 = sld [smem:[#allocation33_spill]]  ;;  %s468_s26 = scalar_lea.vmem [#allocation6], %s1978_s25 }
  0x73   : > { %s464_s14 = sand.u32 1, %s2232_s11  }
  0x74   : > { %s465_s9 = scalar_lea.sflag [#allocation7], %s464_s14 }
  0x75   : > { %1604 = dma.done.wait (%p1811_p6), %s465_s9, 256  }
  0x76   : > { %1606 = vsyncadd (%p1811_p6), %s465_s9, 4294967040  ;;  %s2233_s30 = sld [smem:[#allocation26_spill]]  ;;  %s478_s24 = scalar_lea.vmem [#allocation8], %s1978_s25 }
  0x77   : > { %s485_s15 = scalar_lea.sflag [#allocation10], %s464_s14 }
  0x7c   : > { %s486_s8 = sand.u32 1, %s2233_s30  }
  0x7d   : > { %s1993_s21 = sshll.u32 %s486_s8, 3 }
  0x7e   : > { %s488_s27 = scalar_lea.vmem [#allocation9], %s1993_s21 }
  0x7f   : > { %1608 = dma.done.wait (%p1821_p10), %s485_s15, 256  }
  0x80   : > { %1610 = vsyncadd (%p1821_p10), %s485_s15, 4294967040  ;;  %s498_s7 = scalar_lea.vmem [#allocation11], %s1993_s21  ;;  %s505_s20 = scalar_lea.sflag [#allocation13], %s464_s14 }
  0x81   : > { %s508_s1 = scalar_lea.vmem [#allocation12], %s1993_s21 }
  0x82   : > { %1612 = dma.done.wait (%p1821_p10), %s505_s20, 256  }
  0x83   : > { %1614 = vsyncadd (%p1821_p10), %s505_s20, 4294967040  ;;  %s2235_s0 = sld [smem:[#allocation25_spill]]  ;;  %s518_s11 = scalar_lea.vmem [#allocation14], %s1993_s21 }
  0x84   : > { %s579_s9 = scalar_lea.vmem [#allocation15], %s1978_s25  ;;  %s2236_s8 = sld [smem:[#allocation29_spill]] }
  0x89   : > { %s2174_s16 = sand.u32 1, %s2235_s0  }
  0x8a   : > { %s2010_s28 = sshll.u32 %s2174_s16, 3  ;;  %p1092_p6 = scmp.ne.s32.totalorder %s2236_s8, 0 }
  0x8b   : > { %s2175_s30 = scalar_lea.vmem [#allocation16], %s2010_s28 }
  0x8c   : > { %590 = sbr.rel (%p1092_p6) target bundleno = 147 (0x93), region = 80 }
  0x91   : > { %vm591_vm0 = vcmask 261120   ;;  %v1679_v0 = vmov 0.0  }
  0x92   : > { %592 = vst.msk [vmem:[#allocation2] sm:$0xff] %vm591_vm0, %v1679_v0 }
  0x93 PF: > { %v597_v1 = vld [vmem:[%s498_s7] sm:$0xff]  ;;  %vm600_vm1 = vcmask 261120   ;;  %v596_v2 = vld [vmem:[%s488_s27] sm:$0xff]  ;;  %vm680_vm2 = vcmask 64512  }
  0x94   : > { %1095 = vmatpush.xpose.msk.msra.mxu1 %vm600_vm1, %v597_v1  ;;  %1093 = vmatpush.xpose.msk.msra.mxu0 %vm600_vm1, %v596_v2  ;;  %v594_v3 = vld [vmem:[%s468_s26] sm:$0xff]  ;;  %v593_v4 = vld [vmem:[%s458_s23] sm:$0xff]  ;;  %s2237_s23 = sld [smem:[#allocation29_spill]] }
  0x95   : > { %v598_v8 = vld [vmem:[%s508_s1] sm:$0xff]  ;;  %v595_v9 = vld [vmem:[%s478_s24] sm:$0xff] }
  0x96   : > { %1097 = vmatpush.xpose.msk.msra.mxu2 %vm600_vm1, %v598_v8  ;;  %v599_v18 = vld [vmem:[%s518_s11] sm:$0xff] }
  0x97   : > { %1096 = vmatmul.msk.f32.vlgmr.msra.gmra.mxu1 %vm600_vm1, %v594_v3  ;;  %1094 = vmatmul.msk.f32.vlgmr.msra.gmra.mxu0 %vm600_vm1, %v593_v4 }
  0x98   : > { %761 = vmatpush.msrb.mxu1 %v599_v18 }
  0x99   : > { %1098 = vmatmul.msk.f32.vlgmr.msra.gmra.mxu2 %vm600_vm1, %v595_v9  ;;  %v742_v23 = vld [vmem:[#allocation2] sm:$0xff] }
  0x9a   : > { %p1103_p10 = scmp.ne.s32.totalorder %s2237_s23, 3 }
 0x114   : > { %v650_v5 = vpop.f32.mrf.mxu1  ;;  %v624_v6 = vpop.f32.mrf.mxu0 }
 0x115   : > { %v679_v7 = vmul.f32 0.35355338, %v624_v6  ;;  %1099 = vmatpush.xpose.msk.msra.mxu3 %vm680_vm2, %v650_v5 }
 0x118   : > { %1100 = vmatmul.msk.f32.vlgmr.msra.gmra.mxu3 %vm680_vm2, %v679_v7 }
 0x11c   : > { %v676_v17 = vpop.f32.mrf.mxu2 }
 0x11d   : > { %737 = vmatpush.msrb.mxu0 %v676_v17 }
 0x19b   : > { %v704_v10 = vpop.f32.mrf.mxu3 }
 0x19c   : > { %v707_v11 = vsel %vm680_vm2, %v704_v10, -inf }
 0x19d   : > { %708 = vmax.xlane.f32.xlu0 %v707_v11 }
 0x210   : > { %v709_v12 = vpop.xlane.xlu0 %708 }
 0x211   : > { %v710_v13 = vsub.f32 %v704_v10, %v709_v12 }
 0x213   : > { %v711_v14 = vmul.f32 1.442695, %v710_v13 }
 0x215   : > { %1273 = vpow2.f32 %v711_v14 }
 0x21b   : > { %v1274_v15 = vpop.eup %1273 }
 0x21c   : > { %v713_v16 = vsel %vm680_vm2, %v1274_v15, 0.0 }
 0x21d   : > { %714 = vadd.xlane.f32.xlu0 %v713_v16 }
 0x290   : > { %v715_v19 = vpop.xlane.xlu0 %714 }
 0x291   : > { %1275 = vrcp.f32 %v715_v19 }
 0x297   : > { %v1276_v20 = vpop.eup %1275 }
 0x298   : > { %v717_v21 = vmul.f32 %v1276_v20, %v1274_v15 }
 0x29a   : > { %718 = vst.msk [vmem:[%s2175_s30] sm:$0xff] %vm680_vm2, %v717_v21  ;;  %1101 = vmatmul.msk.f32.vlgmr.msrb.gmra.mxu0 %vm680_vm2, %v717_v21 }
 0x317   : > { %v739_v22 = vpop.f32.mrf.mxu0 }
 0x318   : > { %1102 = vmatmul.msk.f32.vlgmr.msrb.gmra.mxu1 %vm680_vm2, %v739_v22 }
 0x394   : > { %771 = sbr.rel (%p1103_p10) target bundleno = 929 (0x3a1), region = 84 }
 0x395   : > { %v763_v24 = vpop.f32.mrf.mxu1 }
 0x396   : > { %v766_v25 = vadd.f32 %v763_v24, %v742_v23 }
 0x398   : > { %767 = vst.msk [vmem:[#allocation2] sm:$0xff] %vm600_vm1, %v766_v25 }
 0x39f   : > { %v772_v26 = vld [vmem:[#allocation2] sm:$0xff] }
 0x3a0   : > { %773 = vst.msk [vmem:[%s579_s9] sm:$0xff] %vm600_vm1, %v772_v26 }
 0x3a1 PF: > { %s2238_s14 = sld [smem:[#allocation30_spill]]  ;;  %s793_s20 = sshll.u32 %s579_s9, 4  ;;  %s794_s20 = int_to_ptr.vmem [resolvable:$true] %s793_s20 }
 0x3a2   : > { %s2240_s15 = sld [smem:[#allocation50_spill]]  ;;  %s775_s0 = scalar_lea.sflag [#allocation5], %s1975_s19 }
 0x3a7   : > { %s1106_s3 = sshll.u32 %s2238_s14, 3 }
 0x3a8   : > { %s2241_s7 = smov %s2240_s15  ;;  %s791_s27 = scalar_lea.hbm %s2240_s15, %s1106_s3 }
 0x3a9   : > { %s795_s1 = sshll.u32 %s791_s27, 4  ;;  %s1507_s30 = scalar_lea.hbm %s2241_s7, 16  ;;  %s796_s1 = int_to_ptr.hbm [resolvable:$true] %s795_s1 }
 0x3aa   : > { %s1501_s11 = sshra.s32 %s796_s1, 4  ;;  %s1502_s11 = int_to_ptr.hbm [resolvable:$true] %s1501_s11 }
 0x3ab   : > { %s1503_s8 = scalar_lea.hbm %s1502_s11, 8  ;;  %p1508_p2 = scmp.lt.s32.totalorder %s1502_s11, %s2241_s7 }
 0x3ac   : > { %p1504_p7 = scmp.ne.s32.totalorder %s1502_s11, %s1503_s8  ;;  %p1509_p8 = scmp.lt.s32.totalorder %s1507_s30, %s1503_s8 }
 0x3ae   : > { %p1505_p9 = pnand %p1504_p7, %p1825_p12  ;;  %p1510_p0 = por %p1509_p8, %p1508_p2 }
 0x3b0   : > { %p1506_p1 = pneg %p1505_p9 }
 0x3b2   : > { %p1511_p11 = pnand %p1510_p0, %p1506_p1 }
 0x3b4   : > { %1514 = shalt.err (!%p1511_p11)
}
 0x3b5   : > { %s2242_s19 = sld [smem:[#allocation29_spill]]  ;;  %s1107_s3 = sshll.u32 %s2238_s14, 2 }
 0x3b6   : > { %s2243_s25 = sld [smem:[#allocation25_spill]]  ;;  %s2245_s24 = scalar_lea.vmem [#allocation16], %s2010_s28 }
 0x3b7   : > { %1125 = dma.vmem_to_hbm [thread:$0]  (%p1825_p12), %s794_s20, 128, %s796_s1, %s775_s0  }
 0x3b8   : > { %s810_s16 = sshll.u32 %s2245_s24, 4  ;;  %s2246_s11 = sld [smem:[#allocation51_spill]]  ;;  %s811_s16 = int_to_ptr.vmem [resolvable:$true] %s810_s16 }
 0x3bb   : > { %s806_s15 = sadd.s32 %s2242_s19, %s1107_s3 }
 0x3bc   : > { %s1108_s27 = sshll.u32 %s806_s15, 3  ;;  %s2248_s4 = sand.u32 1, %s2243_s25  }
 0x3bd   : > { %s780_s26 = scalar_lea.sflag [#allocation17], %s2248_s4 }
 0x3be   : > { %s2247_s21 = smov %s2246_s11  ;;  %s808_s30 = scalar_lea.hbm %s2246_s11, %s1108_s27 }
 0x3bf   : > { %s812_s8 = sshll.u32 %s808_s30, 4  ;;  %s1535_s20 = scalar_lea.hbm %s2247_s21, 64  ;;  %s813_s8 = int_to_ptr.hbm [resolvable:$true] %s812_s8 }
 0x3c0   : > { %s1529_s5 = sshra.s32 %s813_s8, 4  ;;  %s1530_s5 = int_to_ptr.hbm [resolvable:$true] %s1529_s5 }
 0x3c1   : > { %s1531_s6 = scalar_lea.hbm %s1530_s5, 8  ;;  %p1536_p10 = scmp.lt.s32.totalorder %s1530_s5, %s2247_s21 }
 0x3c2   : > { %p1532_p13 = scmp.ne.s32.totalorder %s1530_s5, %s1531_s6  ;;  %p1537_p7 = scmp.lt.s32.totalorder %s1535_s20, %s1531_s6 }
 0x3c4   : > { %p1533_p12 = pnand %p1532_p13, %p1837_p5  ;;  %p1538_p9 = por %p1537_p7, %p1536_p10 }
 0x3c6   : > { %p1534_p6 = pneg %p1533_p12 }
 0x3c8   : > { %p1539_p1 = pnand %p1538_p9, %p1534_p6 }
 0x3ca   : > { %1542 = shalt.err (!%p1539_p1)
}
 0x3cb   : > { %1126 = dma.vmem_to_hbm [thread:$0]  (%p1837_p5), %s811_s16, 128, %s813_s8, %s780_s26  }
 0x3cc PF: > { %s2249_s4 = sld [smem:[#allocation32_spill]] }
 0x3cd   : > { %s2250_s19 = sld [smem:[#allocation27_spill]] }
 0x3d2   : > { %p1159_p2 = scmp.ge.s32.totalorder %s2249_s4, 2 }
 0x3d3   : > { %s824_s3 = sand.u32 1, %s2250_s19  }
 0x3d4   : > { %p1152_p8 = pnand %p1159_p2, %p1831_p4  ;;  %s825_s24 = scalar_lea.sflag [#allocation5], %s824_s3 }
 0x3d6   : > { %p1153_p0 = pneg %p1152_p8 }
 0x3d8   : > { %1616 = dma.done.wait (%p1153_p0), %s825_s24, 128  }
 0x3d9   : > { %1618 = vsyncadd (%p1153_p0), %s825_s24, 4294967168  ;;  %s2252_s5 = sld [smem:[#allocation24_spill]]  ;;  %p1155_p11 = pnand %p1159_p2, %p1841_p3 }
 0x3db   : > { %p1156_p13 = pneg %p1155_p11 }
 0x3df   : > { %s834_s15 = sand.u32 1, %s2252_s5  }
 0x3e0   : > { %s835_s9 = scalar_lea.sflag [#allocation17], %s834_s15 }
 0x3e1   : > { %1620 = dma.done.wait (%p1156_p13), %s835_s9, 128  }
 0x3e2   : > { %1622 = vsyncadd (%p1156_p13), %s835_s9, 4294967168  ;;  %s37_s23 = sadd.s32 1, %s2249_s4   ;;  %s2255_s27 = sld [smem:[#allocation25_spill]] }
 0x3e3   : > { %p2088_p5 = scmp.ge.s32.totalorder %s37_s23, 10   ;;  %s2256_s30 = sld [smem:[#allocation26_spill]] }
 0x3e4   : > { %s2257_s11 = sld [smem:[#allocation28_spill]]  ;;  %s2258_s2 = smov %s1915_s12 }
 0x3e5   : > { %s2259_s14 = sld [smem:[#allocation31_spill]]  ;;  %s2263_s28 = smov %s1633_s29 }
 0x3e6   : > { %s2260_s8 = sld [smem:[#allocation41_spill]]  ;;  %s2264_s29 = smov %s1918_s22 }
 0x3e7   : > { %s2261_s26 = sld [smem:[#allocation42_spill]]  ;;  %s2265_s9 = smov %s1645_s10 }
 0x3e8   : > { %s2266_s10 = smov %s1904_s18  ;;  %s2267_s12 = smov %s1657_s13 }
 0x3e9   : > { %s2268_s13 = smov %s2258_s2  ;;  %s2269_s15 = smov %s1673_s17 }
 0x3ea   : > { %s2272_s18 = smov %s37_s23  ;;  %36 = sbr.rel (!%p2088_p5) target bundleno = 28 (0x1c), region = 190 }
 0x3ec   : > { %s2270_s16 = smov %s2260_s8 }
 0x3ed   : > { %s2271_s17 = smov %s2261_s26 }
 0x3ef   :  { %841 = vsyncpa [#allocation4], 1 }
 0x3f0   :  { %843 = vsyncpa [#allocation4 + $0x1], 1 }
 0x3f1   :  { %844 = vsyncpa [#allocation7], 1 }
 0x3f2   :  { %846 = vsyncpa [#allocation7 + $0x1], 1 }
 0x3f3   :  { %847 = vsyncpa [#allocation10], 1 }
 0x3f4   :  { %849 = vsyncpa [#allocation10 + $0x1], 1 }
 0x3f5   :  { %850 = vsyncpa [#allocation13], 1 }
 0x3f6   :  { %852 = vsyncpa [#allocation13 + $0x1], 1 }
 0x3f7   :  { %853 = vsyncpa [#allocation5], 1 }
 0x3f8   :  { %855 = vsyncpa [#allocation5 + $0x1], 1 }
 0x3f9   :  { %856 = vsyncpa [#allocation17], 1 }
 0x3fa   :  { %858 = vsyncpa [#allocation17 + $0x1], 1 }

</bundles_post_ra>
